<compile_context>
chip_gen: v5e
topology: v5e:2x2
jax: 0.10.0
libtpu: 0.0.40
codegen_flags: <defaults>
</compile_context>

<pallas_src>
import functools

import jax
import jax.numpy as jnp
from jax.experimental import pallas as pl
from jax.experimental.pallas import tpu as pltpu

INPUT_SIZE = 10
HIDDEN_SIZE = 5
OUTPUT_SIZE = 2

LANE = 128     # vreg lane width
SUBLANE = 8    # vreg sublane count


def _round_up(n, m):
    return ((n + m - 1) // m) * m


def _mlp_kernel(x_ref, w1_ref, b1_ref, w2_ref, b2_ref, o_ref):
    # fc1 + ReLU. Hidden dim is padded to 128 lanes, so the bias add and ReLU
    # are full-vreg VPU ops.
    h = jnp.dot(x_ref[...], w1_ref[...], preferred_element_type=jnp.float32)
    h = jnp.maximum(h + b1_ref[...], 0.0)
    # fc2 at the real output width: the narrow (tb, out_f) store is a single
    # contiguous burst in HBM and tiny next to the input stream.
    y = jnp.dot(h, w2_ref[...], preferred_element_type=jnp.float32)
    o_ref[...] = (y + b2_ref[...]).astype(o_ref.dtype)


@functools.partial(jax.jit, static_argnames=("block_b",))
def simple_nn_forward(x, w1, b1, w2, b2, block_b=1024):
    """Fused forward: relu(x @ w1 + b1) @ w2 + b2.

    x : [B, in]   w1: [in, hid]   b1: [1, hid]   w2: [hid, out]   b2: [1, out]
    (weights stored transposed relative to PyTorch's [out, in]).
    """
    B, in_f = x.shape
    hid = w1.shape[1]
    out_f = w2.shape[1]

    # Batch tile: multiple of 8 sublanes, unconditionally (sublane rule).
    tb = _round_up(min(block_b, B), SUBLANE)
    grid = (pl.cdiv(B, tb),)

    dt = x.dtype
    hid_p = _round_up(hid, LANE)
    # One-time, tiny weight padding (fused under jit). Zero hidden columns give
    # relu(0 + 0) = 0 and contribute nothing to fc2, so results are exact.
    w1_p = jnp.zeros((in_f, hid_p), dt).at[:, :hid].set(w1)
    b1_p = jnp.zeros((1, hid_p), dt).at[:, :hid].set(b1.reshape(1, -1))
    w2_p = jnp.zeros((hid_p, out_f), dt).at[:hid, :].set(w2)
    b2_r = b2.reshape(1, out_f)

    return pl.pallas_call(
        _mlp_kernel,
        out_shape=jax.ShapeDtypeStruct((B, out_f), dt),
        grid=grid,
        in_specs=[
            # x tile: streamed (double-buffered) over the batch grid axis.
            pl.BlockSpec((tb, in_f), lambda i: (i, 0)),
            # weights / biases: same block every step -> stay VMEM-resident.
            pl.BlockSpec((in_f, hid_p), lambda i: (0, 0)),
            pl.BlockSpec((1, hid_p), lambda i: (0, 0)),
            pl.BlockSpec((hid_p, out_f), lambda i: (0, 0)),
            pl.BlockSpec((1, out_f), lambda i: (0, 0)),
        ],
        out_specs=pl.BlockSpec((tb, out_f), lambda i: (i, 0)),
        compiler_params=pltpu.CompilerParams(
            dimension_semantics=("parallel",),
        ),
    )(x, w1_p, b1_p, w2_p, b2_r)


def init_params(key):
    """Deterministic init mimicking PyTorch nn.Linear default U(-1/sqrt(fan_in), +)."""
    k1, k2, k3, k4 = jax.random.split(key, 4)
    bound1 = 1.0 / jnp.sqrt(INPUT_SIZE)
    bound2 = 1.0 / jnp.sqrt(HIDDEN_SIZE)
    # Stored as [in, out] (transpose of PyTorch's [out, in]) for x @ W.
    w1 = jax.random.uniform(k1, (INPUT_SIZE, HIDDEN_SIZE), jnp.float32, -bound1, bound1)
    b1 = jax.random.uniform(k2, (1, HIDDEN_SIZE), jnp.float32, -bound1, bound1)
    w2 = jax.random.uniform(k3, (HIDDEN_SIZE, OUTPUT_SIZE), jnp.float32, -bound2, bound2)
    b2 = jax.random.uniform(k4, (1, OUTPUT_SIZE), jnp.float32, -bound2, bound2)
    return w1, b1, w2, b2


def _reference(x, w1, b1, w2, b2):
    return jnp.maximum(x @ w1 + b1, 0.0) @ w2 + b2


if __name__ == "__main__":
    key = jax.random.PRNGKey(0)
    k_params, k_x1, k_x2 = jax.random.split(key, 3)
    w1, b1, w2, b2 = init_params(k_params)

    # Small batch (single grid step).
    x_small = jax.random.normal(k_x1, (8, INPUT_SIZE), jnp.float32)
    out_small = jax.block_until_ready(simple_nn_forward(x_small, w1, b1, w2, b2))
    ref_small = _reference(x_small, w1, b1, w2, b2)
    assert out_small.shape == (8, OUTPUT_SIZE)
    assert jnp.allclose(out_small, ref_small, atol=1e-5, rtol=1e-5)

    # Larger, non-multiple batch to exercise the ragged-last-block path.
    x_big = jax.random.normal(k_x2, (600, INPUT_SIZE), jnp.float32)
    out_big = jax.block_until_ready(
        simple_nn_forward(x_big, w1, b1, w2, b2, block_b=256)
    )
    ref_big = _reference(x_big, w1, b1, w2, b2)
    assert out_big.shape == (600, OUTPUT_SIZE)
    assert jnp.allclose(out_big, ref_big, atol=1e-5, rtol=1e-5)

    print("KERNEL_OK")
</pallas_src>

<mosaic_0001>
module attributes {stable_mosaic.version = 11 : i64} {
  func.func @_mlp_kernel(%arg0: i32, %arg1: memref<8x10xf32, #tpu.memory_space<vmem>>, %arg2: memref<10x128xf32, #tpu.memory_space<vmem>>, %arg3: memref<1x128xf32, #tpu.memory_space<vmem>>, %arg4: memref<128x2xf32, #tpu.memory_space<vmem>>, %arg5: memref<1x2xf32, #tpu.memory_space<vmem>>, %arg6: memref<8x2xf32, #tpu.memory_space<vmem>>) attributes {dimension_semantics = [#tpu.dimension_semantics<parallel>], iteration_bounds = array<i64: 1>, scalar_prefetch = 0 : i64, scratch_operands = 0 : i64, tpu.core_type = #tpu.core_type<tc>, window_params = [{transform_indices = @transform_0, window_bounds = array<i64: 8, 10>}, {pipeline_mode = #tpu.pipeline_mode<synchronous>, transform_indices = @transform_1, window_bounds = array<i64: 10, 128>}, {pipeline_mode = #tpu.pipeline_mode<synchronous>, transform_indices = @transform_2, window_bounds = array<i64: 1, 128>}, {pipeline_mode = #tpu.pipeline_mode<synchronous>, transform_indices = @transform_3, window_bounds = array<i64: 128, 2>}, {pipeline_mode = #tpu.pipeline_mode<synchronous>, transform_indices = @transform_4, window_bounds = array<i64: 1, 2>}, {transform_indices = @transform_5, window_bounds = array<i64: 8, 2>}]} {
    %c0 = arith.constant 0 : index
    %c0_0 = arith.constant 0 : index
    %0 = vector.load %arg1[%c0, %c0_0] : memref<8x10xf32, #tpu.memory_space<vmem>>, vector<8x10xf32>
    %c0_1 = arith.constant 0 : index
    %c0_2 = arith.constant 0 : index
    %1 = vector.load %arg2[%c0_1, %c0_2] : memref<10x128xf32, #tpu.memory_space<vmem>>, vector<10x128xf32>
    %cst = arith.constant dense<0.000000e+00> : vector<8x128xf32>
    %2 = tpu.matmul %0, %1, %cst {dimension_numbers = #tpu.dot_dimension_numbers<[1], [0], [0], [1], [0, 0, 1, 1], [], []>} : vector<8x10xf32>, vector<10x128xf32>, vector<8x128xf32> -> vector<8x128xf32>
    %c0_3 = arith.constant 0 : index
    %c0_4 = arith.constant 0 : index
    %3 = vector.load %arg3[%c0_3, %c0_4] : memref<1x128xf32, #tpu.memory_space<vmem>>, vector<1x128xf32>
    %4 = vector.broadcast %3 : vector<1x128xf32> to vector<8x128xf32>
    %5 = arith.addf %2, %4 : vector<8x128xf32>
    %cst_5 = arith.constant 0.000000e+00 : f32
    %6 = vector.broadcast %cst_5 : f32 to vector<8x128xf32>
    %7 = arith.maximumf %5, %6 : vector<8x128xf32>
    %c0_6 = arith.constant 0 : index
    %c0_7 = arith.constant 0 : index
    %8 = vector.load %arg4[%c0_6, %c0_7] : memref<128x2xf32, #tpu.memory_space<vmem>>, vector<128x2xf32>
    %cst_8 = arith.constant dense<0.000000e+00> : vector<8x2xf32>
    %9 = tpu.matmul %7, %8, %cst_8 {dimension_numbers = #tpu.dot_dimension_numbers<[1], [0], [0], [1], [0, 0, 1, 1], [], []>} : vector<8x128xf32>, vector<128x2xf32>, vector<8x2xf32> -> vector<8x2xf32>
    %c0_9 = arith.constant 0 : index
    %c0_10 = arith.constant 0 : index
    %10 = vector.load %arg5[%c0_9, %c0_10] : memref<1x2xf32, #tpu.memory_space<vmem>>, vector<1x2xf32>
    %11 = vector.broadcast %10 : vector<1x2xf32> to vector<8x2xf32>
    %12 = arith.addf %9, %11 : vector<8x2xf32>
    %c0_11 = arith.constant 0 : index
    %c0_12 = arith.constant 0 : index
    %13 = vector.load %arg6[%c0_11, %c0_12] : memref<8x2xf32, #tpu.memory_space<vmem>>, vector<8x2xf32>
    tpu.vector_store %arg6[%c0_11, %c0_12], %12 {strides = array<i32>} : memref<8x2xf32, #tpu.memory_space<vmem>>, vector<8x2xf32>,
    return
  }
  func.func @transform_0(%arg0: i32) -> (i32, i32) {
    %c0_i32 = arith.constant 0 : i32
    %c0_i32_0 = arith.constant 0 : i32
    return %arg0, %c0_i32 : i32, i32
  }
  func.func @transform_1(%arg0: i32) -> (i32, i32) {
    %c0_i32 = arith.constant 0 : i32
    %c0_i32_0 = arith.constant 0 : i32
    %c0_i32_1 = arith.constant 0 : i32
    return %c0_i32, %c0_i32_0 : i32, i32
  }
  func.func @transform_2(%arg0: i32) -> (i32, i32) {
    %c0_i32 = arith.constant 0 : i32
    %c0_i32_0 = arith.constant 0 : i32
    %c0_i32_1 = arith.constant 0 : i32
    return %c0_i32, %c0_i32_0 : i32, i32
  }
  func.func @transform_3(%arg0: i32) -> (i32, i32) {
    %c0_i32 = arith.constant 0 : i32
    %c0_i32_0 = arith.constant 0 : i32
    %c0_i32_1 = arith.constant 0 : i32
    return %c0_i32, %c0_i32_0 : i32, i32
  }
  func.func @transform_4(%arg0: i32) -> (i32, i32) {
    %c0_i32 = arith.constant 0 : i32
    %c0_i32_0 = arith.constant 0 : i32
    %c0_i32_1 = arith.constant 0 : i32
    return %c0_i32, %c0_i32_0 : i32, i32
  }
  func.func @transform_5(%arg0: i32) -> (i32, i32) {
    %c0_i32 = arith.constant 0 : i32
    %c0_i32_0 = arith.constant 0 : i32
    return %arg0, %c0_i32 : i32, i32
  }
}

</mosaic_0001>

<bundles_post_ra>
// kernel: simple_nn_forward.1
= control target key start
LH: loop header
LB: loop body
LE: loop exit
PB: predicated region body
PF: predicated region fallthrough
CT: control target
= control target key end

     0   :  { %vm31_vm0 = vcmask 1041408   ;;  %vm27_vm1 = vcmask 80896   ;;  %vm96_vm2 = vcmask 15360   ;;  %s202_s1 = inlined_call_operand.vmem [shape: f32[10,128], index: 1, kind: input, shape index: {}]   ;;  %s203_s0 = inlined_call_operand.vmem [shape: f32[8,10], index: 0, kind: input, shape index: {}]   ;;  %s204_s3 = inlined_call_operand.vmem [shape: f32[128,2], index: 3, kind: input, shape index: {}]   ;;  %s205_s2 = inlined_call_operand.vmem [shape: f32[1,128], index: 2, kind: input, shape index: {}]   ;;  %s206_s4 = inlined_call_operand.vmem [shape: f32[1,2], index: 4, kind: input, shape index: {}]   ;;  %s207_s5 = inlined_call_operand.vmem [shape: f32[8,2], index: 5, kind: output, shape index: {}]  }
   0x1   :  { %v22_v0 = vld [vmem:[%s202_s1 + $0x8] sm:$0x3]  ;;  %v21_v1 = vld [vmem:[%s202_s1] sm:$0xff]  ;;  %v71_v3 = vld [vmem:[%s204_s3 + $0x78] sm:$0xff] }
   0x2   :  { %102 = vmatpush.msk.msra.mxu0 %vm31_vm0, %v22_v0  ;;  %v20_v2 = vld [vmem:[%s203_s0] sm:$0xff]  ;;  %v70_v4 = vld [vmem:[%s204_s3 + $0x70] sm:$0xff]  ;;  %76 = vmatpush.msra.mxu1 %v71_v3  ;;  %v69_v5 = vld [vmem:[%s204_s3 + $0x68] sm:$0xff] }
   0x3   :  { %v68_v6 = vld [vmem:[%s204_s3 + $0x60] sm:$0xff]  ;;  %v67_v7 = vld [vmem:[%s204_s3 + $0x58] sm:$0xff]  ;;  %v66_v8 = vld [vmem:[%s204_s3 + $0x50] sm:$0xff] }
   0x4   :  { %50 = vmatpush.msra.mxu0 %v21_v1  ;;  %77 = vmatpush.msra.mxu1 %v70_v4  ;;  %v65_v9 = vld [vmem:[%s204_s3 + $0x48] sm:$0xff]  ;;  %v64_v10 = vld [vmem:[%s204_s3 + $0x40] sm:$0xff]  ;;  %v63_v11 = vld [vmem:[%s204_s3 + $0x38] sm:$0xff] }
   0x5   :  { %103 = vmatmul.msk.f32.vlgmr.msra.gmra.mxu0 %vm27_vm1, %v20_v2  ;;  %v62_v12 = vld [vmem:[%s204_s3 + $0x30] sm:$0xff]  ;;  %v61_v13 = vld [vmem:[%s204_s3 + $0x28] sm:$0xff]  ;;  %v60_v14 = vld [vmem:[%s204_s3 + $0x20] sm:$0xff] }
   0x6   :  { %78 = vmatpush.msra.mxu1 %v69_v5  ;;  %v59_v15 = vld [vmem:[%s204_s3 + $0x18] sm:$0xff]  ;;  %v58_v16 = vld [vmem:[%s204_s3 + $0x10] sm:$0xff]  ;;  %v57_v17 = vld [vmem:[%s204_s3 + $0x8] sm:$0xff] }
   0x7   :  { %v56_v18 = vld [vmem:[%s204_s3] sm:$0xff] }
   0x8   :  { %79 = vmatpush.msra.mxu1 %v68_v6  ;;  %v104_v19 = vld [vmem:[%s205_s2] ss:$0 sm:$0xff] }
   0x9   :  { %v105_v23 = vld [vmem:[%s206_s4] ss:$0 sm:$0xff] }
   0xa   :  { %80 = vmatpush.msra.mxu1 %v67_v7 }
   0xc   :  { %81 = vmatpush.msra.mxu1 %v66_v8 }
   0xe   :  { %82 = vmatpush.msra.mxu1 %v65_v9 }
  0x10   :  { %83 = vmatpush.msra.mxu1 %v64_v10 }
  0x12   :  { %84 = vmatpush.msra.mxu1 %v63_v11 }
  0x14   :  { %85 = vmatpush.msra.mxu1 %v62_v12 }
  0x16   :  { %86 = vmatpush.msra.mxu1 %v61_v13 }
  0x18   :  { %87 = vmatpush.msra.mxu1 %v60_v14 }
  0x1a   :  { %88 = vmatpush.msra.mxu1 %v59_v15 }
  0x1c   :  { %89 = vmatpush.msra.mxu1 %v58_v16 }
  0x1e   :  { %90 = vmatpush.msra.mxu1 %v57_v17 }
  0x20   :  { %91 = vmatpush.msra.mxu1 %v56_v18 }
  0x82   :  { %v52_v20 = vpop.f32.mrf.mxu0 }
  0x83   :  { %v53_v21 = vadd.f32 %v104_v19, %v52_v20 }
  0x85   :  { %v55_v22 = vmax.f32 %v53_v21, 0.0 }
  0x87   :  { %92 = vmatmul.f32.vlgmr.msra.gmra.mxu1 %v55_v22 }
 0x104   :  { %v93_v24 = vpop.f32.mrf.mxu1 }
 0x105   :  { %v94_v25 = vadd.f32 %v105_v23, %v93_v24 }
 0x107   :  { %97 = vst.msk [vmem:[%s207_s5] sm:$0xff] %vm96_vm2, %v94_v25 }

</bundles_post_ra>
